<compile_context>
chip_gen: v7x
topology: tpu7x:2x2x1
jax: 0.10.0
libtpu: 0.0.40
codegen_flags: <defaults>
</compile_context>

<pallas_src>
import jax
import jax.numpy as jnp
from jax import lax
from jax.experimental import pallas as pl
from jax.experimental.pallas import tpu as pltpu

PAD_idx = 0


def _round_up(x, m):
    return (x + m - 1) // m * m


def _token_encoder_kernel(tok_ref, len_ref, emb_ref, out_ref, acc_ref):
    # tok_ref: (tb, L)  int32  VMEM -- token ids for this batch tile
    # len_ref: (tb, 1)  f32    VMEM -- declared lengths for this batch tile
    # emb_ref: (tv, D)  float  VMEM -- current vocab tile of the table
    # out_ref: (tb, D)  f32    VMEM -- output tile (same block across vocab axis)
    # acc_ref: (tb, D)  f32    VMEM scratch accumulator
    v = pl.program_id(1)
    tb, seq_len = tok_ref.shape
    tv = emb_ref.shape[0]

    @pl.when(v == 0)
    def _():
        acc_ref[...] = jnp.zeros_like(acc_ref)

    toks = tok_ref[...]  # (tb, L) int32
    # Vocab ids covered by this table tile, one per lane column.
    col = lax.broadcasted_iota(jnp.int32, (tb, tv), 1) + v * tv

    # Count matrix S[r, c] = #{ l : tok[r, l] == v*tv + c }.
    # Static Python loop over L (L is a compile-time constant, single live
    # accumulator -> no vreg-pressure blowup); each step is one dense (tb, tv)
    # compare+add on the VPU.
    counts = jnp.zeros((tb, tv), jnp.float32)
    for l in range(seq_len):
        counts = counts + (toks[:, l:l + 1] == col).astype(jnp.float32)

    # One MXU pass: (tb, tv) x (tv, D) partial embedding sums, accumulated f32.
    acc_ref[...] += jnp.dot(
        counts.astype(emb_ref.dtype),
        emb_ref[...],
        preferred_element_type=jnp.float32,
    )

    @pl.when(v == pl.num_programs(1) - 1)
    def _():
        inv_len = 1.0 / len_ref[...]                 # (tb, 1), exact
        out_ref[...] = (acc_ref[...] * inv_len).astype(out_ref.dtype)


def token_encoder_forward(tok_batch, tok_lens, emb_table, *, tb_max=128, tv_max=512):
    """tok_batch: (B, L) int, tok_lens: (B,) int, emb_table: (V, D) float -> (B, D) f32.

    tb_max: batch tile (128 default; 256 can better feed the 2x256^2 MXU on v6e/v7x).
    tv_max: vocab tile streamed from HBM per reduction step.
    """
    B, L = tok_batch.shape
    V, D = emb_table.shape
    itemsize = emb_table.dtype.itemsize

    # ---- batch tile: multiple of 8, keep >=2 parallel grid steps when possible
    B8 = _round_up(B, 8)
    tb = min(tb_max, B8)
    if B8 // tb < 2 and B8 >= 16:     # leave work for the 2nd TensorCore (v7x)
        tb = max(8, _round_up(B8 // 2, 8))
    B_pad = _round_up(B, tb)

    # ---- vocab tile: bound the (tv, D) table block to ~2 MiB of VMEM
    tv = tv_max
    while tv > 8 and tv * D * itemsize > (2 << 20):
        tv //= 2
    tv = max(8, min(tv, _round_up(V, 8)))
    tv = _round_up(tv, 8)
    V_pad = _round_up(V, tv)

    # ---- pad inputs (padded batch rows: PAD tokens, length 1; padded vocab: 0)
    tok_i32 = tok_batch.astype(jnp.int32)
    lens_f = tok_lens.astype(jnp.float32)
    if B_pad != B:
        tok_i32 = jnp.pad(tok_i32, ((0, B_pad - B), (0, 0)), constant_values=PAD_idx)
        lens_f = jnp.pad(lens_f, (0, B_pad - B), constant_values=1.0)
    lens_f = lens_f.reshape(B_pad, 1)
    emb = emb_table
    if V_pad != V:
        emb = jnp.pad(emb, ((0, V_pad - V), (0, 0)))

    grid = (B_pad // tb, V_pad // tv)

    # VMEM budget (double-buffered inputs/outputs + scratch); raise limit only
    # if a large D / tv combination needs it.
    vmem_est = (2 * tb * L * 4 + 2 * tb * 4 + 2 * tv * D * itemsize
                + 2 * tb * D * 4 + tb * D * 4 + (1 << 20))
    compiler_kwargs = dict(dimension_semantics=("parallel", "arbitrary"))
    if vmem_est > (16 << 20):
        compiler_kwargs["vmem_limit_bytes"] = int(min(vmem_est, 100 << 20))

    grid_spec = pltpu.PrefetchScalarGridSpec(
        num_scalar_prefetch=0,
        grid=grid,
        in_specs=[
            pl.BlockSpec((tb, L), lambda i, v: (i, 0)),   # tokens (per batch tile)
            pl.BlockSpec((tb, 1), lambda i, v: (i, 0)),   # lengths (per batch tile)
            pl.BlockSpec((tv, D), lambda i, v: (v, 0)),   # table tile (streamed)
        ],
        out_specs=pl.BlockSpec((tb, D), lambda i, v: (i, 0)),
        scratch_shapes=[pltpu.VMEM((tb, D), jnp.float32)],
    )

    out = pl.pallas_call(
        _token_encoder_kernel,
        out_shape=jax.ShapeDtypeStruct((B_pad, D), jnp.float32),
        grid_spec=grid_spec,
        compiler_params=pltpu.CompilerParams(**compiler_kwargs),
    )(tok_i32, lens_f, emb)
    return out[:B]


def make_params(tok_cnt, emb_dim, key):
    uniform_range = 6.0 / emb_dim ** 0.5
    w = jax.random.uniform(
        key, (tok_cnt, emb_dim), dtype=jnp.float32,
        minval=-uniform_range, maxval=uniform_range,
    )
    # nn.Embedding(padding_idx=0) keeps row 0 at zero.
    w = w.at[PAD_idx].set(0.0)
    return w


def reference_forward(tok_batch, tok_lens, emb_table):
    embs = jnp.take(emb_table, tok_batch, axis=0)           # (B, L, D)
    summed = embs.sum(axis=1)                               # (B, D)
    return summed / tok_lens.astype(jnp.float32)[:, None]   # (B, D)


if __name__ == "__main__":
    tok_cnt, emb_dim = 64, 128
    B, L = 2, 8

    key = jax.random.PRNGKey(0)
    k_w, k_tok, k_len = jax.random.split(key, 3)

    emb_table = make_params(tok_cnt, emb_dim, k_w)

    tok_lens = jax.random.randint(k_len, (B,), minval=1, maxval=L + 1, dtype=jnp.int32)
    tok_batch = jax.random.randint(k_tok, (B, L), minval=1, maxval=tok_cnt, dtype=jnp.int32)
    # Positions >= tok_lens[b] are PAD (id 0), matching typical padded batches.
    pos = jnp.arange(L, dtype=jnp.int32)[None, :]
    tok_batch = jnp.where(pos < tok_lens[:, None], tok_batch, PAD_idx).astype(jnp.int32)

    out = token_encoder_forward(tok_batch, tok_lens, emb_table)
    out = jax.block_until_ready(out)

    ref = reference_forward(tok_batch, tok_lens, emb_table)
    assert out.shape == (B, emb_dim)
    assert jnp.allclose(out, ref, atol=1e-5, rtol=1e-5), "mismatch vs reference"

    print("KERNEL_OK")
</pallas_src>

<mosaic_0001>
module attributes {stable_mosaic.version = 11 : i64} {
  func.func @_token_encoder_kernel(%arg0: i32, %arg1: i32, %arg2: memref<8x8xi32, #tpu.memory_space<vmem>>, %arg3: memref<8x1xf32, #tpu.memory_space<vmem>>, %arg4: memref<64x128xf32, #tpu.memory_space<vmem>>, %arg5: memref<8x128xf32, #tpu.memory_space<vmem>>, %arg6: memref<8x128xf32, #tpu.memory_space<vmem>>) attributes {dimension_semantics = [#tpu.dimension_semantics<parallel>, #tpu.dimension_semantics<arbitrary>], iteration_bounds = array<i64: 1, 1>, scalar_prefetch = 0 : i64, scratch_operands = 1 : i64, tpu.core_type = #tpu.core_type<tc>, window_params = [{transform_indices = @transform_0, window_bounds = array<i64: 8, 8>}, {transform_indices = @transform_1, window_bounds = array<i64: 8, 1>}, {transform_indices = @transform_2, window_bounds = array<i64: 64, 128>}, {transform_indices = @transform_3, window_bounds = array<i64: 8, 128>}]} {
    %c0_i32 = arith.constant 0 : i32
    %0 = arith.cmpi eq, %arg1, %c0_i32 : i32
    %1 = arith.extui %0 : i1 to i32
    %c0_i32_0 = arith.constant 0 : i32
    %2 = arith.cmpi ne, %1, %c0_i32_0 : i32
    scf.if %2 {
      %cst_11 = arith.constant 0.000000e+00 : f32
      %65 = vector.broadcast %cst_11 : f32 to vector<8x128xf32>
      %c0_12 = arith.constant 0 : index
      %c0_13 = arith.constant 0 : index
      %66 = vector.load %arg6[%c0_12, %c0_13] : memref<8x128xf32, #tpu.memory_space<vmem>>, vector<8x128xf32>
      tpu.vector_store %arg6[%c0_12, %c0_13], %65 {strides = array<i32>} : memref<8x128xf32, #tpu.memory_space<vmem>>, vector<8x128xf32>,
    } else {
    }
    %c0 = arith.constant 0 : index
    %c0_1 = arith.constant 0 : index
    %3 = vector.load %arg2[%c0, %c0_1] : memref<8x8xi32, #tpu.memory_space<vmem>>, vector<8x8xi32>
    %4 = tpu.iota {dimensions = array<i32: 1>} : vector<8x64xi32>
    %c64_i32 = arith.constant 64 : i32
    %5 = arith.muli %arg1, %c64_i32 : i32
    %6 = vector.broadcast %5 : i32 to vector<8x64xi32>
    %7 = arith.addi %4, %6 : vector<8x64xi32>
    %cst = arith.constant 0.000000e+00 : f32
    %8 = vector.broadcast %cst : f32 to vector<8x64xf32>
    %9 = vector.extract_strided_slice %3 {offsets = [0, 0], sizes = [8, 1], strides = [1, 1]} : vector<8x8xi32> to vector<8x1xi32>
    %10 = vector.broadcast %9 : vector<8x1xi32> to vector<8x64xi32>
    %11 = arith.cmpi eq, %10, %7 : vector<8x64xi32>
    %12 = arith.extui %11 : vector<8x64xi1> to vector<8x64xi32>
    %13 = arith.sitofp %12 : vector<8x64xi32> to vector<8x64xf32>
    %14 = arith.addf %8, %13 : vector<8x64xf32>
    %15 = vector.extract_strided_slice %3 {offsets = [0, 1], sizes = [8, 1], strides = [1, 1]} : vector<8x8xi32> to vector<8x1xi32>
    %16 = vector.broadcast %15 : vector<8x1xi32> to vector<8x64xi32>
    %17 = arith.cmpi eq, %16, %7 : vector<8x64xi32>
    %18 = arith.extui %17 : vector<8x64xi1> to vector<8x64xi32>
    %19 = arith.sitofp %18 : vector<8x64xi32> to vector<8x64xf32>
    %20 = arith.addf %14, %19 : vector<8x64xf32>
    %21 = vector.extract_strided_slice %3 {offsets = [0, 2], sizes = [8, 1], strides = [1, 1]} : vector<8x8xi32> to vector<8x1xi32>
    %22 = vector.broadcast %21 : vector<8x1xi32> to vector<8x64xi32>
    %23 = arith.cmpi eq, %22, %7 : vector<8x64xi32>
    %24 = arith.extui %23 : vector<8x64xi1> to vector<8x64xi32>
    %25 = arith.sitofp %24 : vector<8x64xi32> to vector<8x64xf32>
    %26 = arith.addf %20, %25 : vector<8x64xf32>
    %27 = vector.extract_strided_slice %3 {offsets = [0, 3], sizes = [8, 1], strides = [1, 1]} : vector<8x8xi32> to vector<8x1xi32>
    %28 = vector.broadcast %27 : vector<8x1xi32> to vector<8x64xi32>
    %29 = arith.cmpi eq, %28, %7 : vector<8x64xi32>
    %30 = arith.extui %29 : vector<8x64xi1> to vector<8x64xi32>
    %31 = arith.sitofp %30 : vector<8x64xi32> to vector<8x64xf32>
    %32 = arith.addf %26, %31 : vector<8x64xf32>
    %33 = vector.extract_strided_slice %3 {offsets = [0, 4], sizes = [8, 1], strides = [1, 1]} : vector<8x8xi32> to vector<8x1xi32>
    %34 = vector.broadcast %33 : vector<8x1xi32> to vector<8x64xi32>
    %35 = arith.cmpi eq, %34, %7 : vector<8x64xi32>
    %36 = arith.extui %35 : vector<8x64xi1> to vector<8x64xi32>
    %37 = arith.sitofp %36 : vector<8x64xi32> to vector<8x64xf32>
    %38 = arith.addf %32, %37 : vector<8x64xf32>
    %39 = vector.extract_strided_slice %3 {offsets = [0, 5], sizes = [8, 1], strides = [1, 1]} : vector<8x8xi32> to vector<8x1xi32>
    %40 = vector.broadcast %39 : vector<8x1xi32> to vector<8x64xi32>
    %41 = arith.cmpi eq, %40, %7 : vector<8x64xi32>
    %42 = arith.extui %41 : vector<8x64xi1> to vector<8x64xi32>
    %43 = arith.sitofp %42 : vector<8x64xi32> to vector<8x64xf32>
    %44 = arith.addf %38, %43 : vector<8x64xf32>
    %45 = vector.extract_strided_slice %3 {offsets = [0, 6], sizes = [8, 1], strides = [1, 1]} : vector<8x8xi32> to vector<8x1xi32>
    %46 = vector.broadcast %45 : vector<8x1xi32> to vector<8x64xi32>
    %47 = arith.cmpi eq, %46, %7 : vector<8x64xi32>
    %48 = arith.extui %47 : vector<8x64xi1> to vector<8x64xi32>
    %49 = arith.sitofp %48 : vector<8x64xi32> to vector<8x64xf32>
    %50 = arith.addf %44, %49 : vector<8x64xf32>
    %51 = vector.extract_strided_slice %3 {offsets = [0, 7], sizes = [8, 1], strides = [1, 1]} : vector<8x8xi32> to vector<8x1xi32>
    %52 = vector.broadcast %51 : vector<8x1xi32> to vector<8x64xi32>
    %53 = arith.cmpi eq, %52, %7 : vector<8x64xi32>
    %54 = arith.extui %53 : vector<8x64xi1> to vector<8x64xi32>
    %55 = arith.sitofp %54 : vector<8x64xi32> to vector<8x64xf32>
    %56 = arith.addf %50, %55 : vector<8x64xf32>
    %c0_2 = arith.constant 0 : index
    %c0_3 = arith.constant 0 : index
    %57 = vector.load %arg6[%c0_2, %c0_3] : memref<8x128xf32, #tpu.memory_space<vmem>>, vector<8x128xf32>
    %c0_4 = arith.constant 0 : index
    %c0_5 = arith.constant 0 : index
    %58 = vector.load %arg4[%c0_4, %c0_5] : memref<64x128xf32, #tpu.memory_space<vmem>>, vector<64x128xf32>
    %cst_6 = arith.constant dense<0.000000e+00> : vector<8x128xf32>
    %59 = tpu.matmul %56, %58, %cst_6 {dimension_numbers = #tpu.dot_dimension_numbers<[1], [0], [0], [1], [0, 0, 1, 1], [], []>} : vector<8x64xf32>, vector<64x128xf32>, vector<8x128xf32> -> vector<8x128xf32>
    %60 = arith.addf %57, %59 : vector<8x128xf32>
    %c0_7 = arith.constant 0 : index
    %c0_8 = arith.constant 0 : index
    %61 = vector.load %arg6[%c0_7, %c0_8] : memref<8x128xf32, #tpu.memory_space<vmem>>, vector<8x128xf32>
    tpu.vector_store %arg6[%c0_7, %c0_8], %60 {strides = array<i32>} : memref<8x128xf32, #tpu.memory_space<vmem>>, vector<8x128xf32>,
    %c0_i32_9 = arith.constant 0 : i32
    %62 = arith.cmpi eq, %arg1, %c0_i32_9 : i32
    %63 = arith.extui %62 : i1 to i32
    %c0_i32_10 = arith.constant 0 : i32
    %64 = arith.cmpi ne, %63, %c0_i32_10 : i32
    scf.if %64 {
      %c0_11 = arith.constant 0 : index
      %c0_12 = arith.constant 0 : index
      %65 = vector.load %arg3[%c0_11, %c0_12] : memref<8x1xf32, #tpu.memory_space<vmem>>, vector<8x1xf32>
      %cst_13 = arith.constant 1.000000e+00 : f32
      %66 = vector.broadcast %cst_13 : f32 to vector<8x1xf32>
      %67 = arith.divf %66, %65 : vector<8x1xf32>
      %c0_14 = arith.constant 0 : index
      %c0_15 = arith.constant 0 : index
      %68 = vector.load %arg6[%c0_14, %c0_15] : memref<8x128xf32, #tpu.memory_space<vmem>>, vector<8x128xf32>
      %69 = vector.broadcast %67 : vector<8x1xf32> to vector<8x128xf32>
      %70 = arith.mulf %68, %69 : vector<8x128xf32>
      %c0_16 = arith.constant 0 : index
      %c0_17 = arith.constant 0 : index
      %71 = vector.load %arg5[%c0_16, %c0_17] : memref<8x128xf32, #tpu.memory_space<vmem>>, vector<8x128xf32>
      tpu.vector_store %arg5[%c0_16, %c0_17], %70 {strides = array<i32>} : memref<8x128xf32, #tpu.memory_space<vmem>>, vector<8x128xf32>,
    } else {
    }
    return
  }
  func.func @transform_0(%arg0: i32, %arg1: i32) -> (i32, i32) {
    %c0_i32 = arith.constant 0 : i32
    %c0_i32_0 = arith.constant 0 : i32
    return %arg0, %c0_i32 : i32, i32
  }
  func.func @transform_1(%arg0: i32, %arg1: i32) -> (i32, i32) {
    %c0_i32 = arith.constant 0 : i32
    %c0_i32_0 = arith.constant 0 : i32
    return %arg0, %c0_i32 : i32, i32
  }
  func.func @transform_2(%arg0: i32, %arg1: i32) -> (i32, i32) {
    %c0_i32 = arith.constant 0 : i32
    %c0_i32_0 = arith.constant 0 : i32
    return %arg1, %c0_i32 : i32, i32
  }
  func.func @transform_3(%arg0: i32, %arg1: i32) -> (i32, i32) {
    %c0_i32 = arith.constant 0 : i32
    %c0_i32_0 = arith.constant 0 : i32
    return %arg0, %c0_i32 : i32, i32
  }
}

</mosaic_0001>

<bundles_post_ra>
// kernel: tpu_custom_call.1
= control target key start
LH: loop header
LB: loop body
LE: loop exit
PB: predicated region body
PF: predicated region fallthrough
CT: control target
= control target key end

     0   :  { %8 = vsyncpa [#allocation4], 0  ;;  %s398_s0 = inlined_call_operand.vmem [shape: s32[8,8], index: 0, kind: input, shape index: {}]   ;;  %s399_s1 = inlined_call_operand.vmem [shape: f32[8,1], index: 1, kind: input, shape index: {}]   ;;  %s400_s2 = inlined_call_operand.hbm [shape: f32[64,128], index: 2, kind: input, shape index: {}]   ;;  %s401_s3 = inlined_call_operand.hbm [shape: f32[8,128], index: 3, kind: output, shape index: {}]  }
   0x1   :  { %9 = vsyncpa [#allocation5], 0  ;;  %s333_s12 = smov [#allocation3]   ;;  %s285_s16 = scalar_lea.hbm %s400_s2, 1024 }
   0x2   :  { %s19_s13 = sshll.u32 %s333_s12, 4  ;;  %p286_p0 = scmp.ne.s32.totalorder %s400_s2, %s285_s16  ;;  %s20_s13 = int_to_ptr.vmem [resolvable:$true] %s19_s13 }
   0x3   :  { %p289_p1 = scmp.lt.u32.totalorder %s285_s16, %s400_s2 }
   0x5   :  { %p291_p2 = pnand %p289_p1, %p286_p0 }
   0x7   :  { %294 = shalt.err (!%p291_p2)
}
   0x8   :  { %s295_s21 = scalar_lea.vmem %s20_s13, 1024  ;;  %p300_p4 = scmp.lt.s32.totalorder %s20_s13, %s20_s13 }
   0x9   :  { %p296_p3 = scmp.ne.s32.totalorder %s20_s13, %s295_s21  ;;  %p301_p5 = scmp.lt.s32.totalorder %s295_s21, %s295_s21 }
   0xb   :  { %p302_p6 = por %p301_p5, %p300_p4 }
   0xd   :  { %p303_p7 = pnand %p302_p6, %p296_p3 }
   0xf   :  { %306 = shalt.err (!%p303_p7)
}
  0x10   :  { %s334_s22 = smov 128   ;;  %s335_s23 = smov 8  }
  0x11   :  { %25 = dma.hbm_to_vmem [thread:$0]  %s400_s2, 1024, %s20_s13, [#allocation4], %s334_s22, %s334_s22, %s335_s23  }
  0x12   :  { %329 = dma.done.wait [#allocation4], 1024  }
  0x13   :  { %330 = vsyncadd [#allocation4], 4294966272  ;;  %v336_v0 = vmov 2   ;;  %v337_v1 = vmov 0   ;;  %v34_v2 = vld [vmem:[%s398_s0] sm:$0xff]  ;;  %v338_v3 = vmov 3   ;;  %v35_v25 = vlaneseq }
  0x14   :  { %276 = vset.pattern.permute.xlu1 %v336_v0  ;;  %274 = vset.pattern.permute.xlu0 %v337_v1  ;;  %v339_v4 = vmov 1   ;;  %v97_v5 = vld [vmem:[#allocation3] sm:$0xff]  ;;  %v98_v6 = vld [vmem:[#allocation3 + $0x8] sm:$0xff]  ;;  %v340_v8 = vmov 0.0|0.0   ;;  %v341_v9 = vmov 4   ;;  %v342_v10 = vmov 5  }
  0x15   :  { %55 = vperm.xlu1 %276, %v34_v2   ;;  %41 = vperm.xlu0 %274, %v34_v2   ;;  %v248_v7 = vpack.c.bf16 %v98_v6, %v97_v5  ;;  %v99_v11 = vld [vmem:[#allocation3 + $0x10] sm:$0xff]  ;;  %v100_v12 = vld [vmem:[#allocation3 + $0x18] sm:$0xff]  ;;  %v343_v14 = vmov 6   ;;  %v101_v15 = vld [vmem:[#allocation3 + $0x20] sm:$0xff]  ;;  %v344_v20 = vmov 7   ;;  %vm345_vm0 = vmmov 0  }
  0x16   :  { %247 = vmatprep.subr.bf16.mxu0 %v340_v8  ;;  %v251_v13 = vpack.c.bf16 %v100_v12, %v99_v11  ;;  %v102_v16 = vld [vmem:[#allocation3 + $0x28] sm:$0xff]  ;;  %v103_v18 = vld [vmem:[#allocation3 + $0x30] sm:$0xff]  ;;  %v104_v19 = vld [vmem:[#allocation3 + $0x38] sm:$0xff]  ;;  %v346_v22 = vmov 0.0   ;;  %v36_v28 = vand.u32 127, %v35_v25  ;;  %vm105_vm9 = vcmask 523264  }
  0x17   :  { %249 = vmatpush3.bf16.msra.mxu0 %v248_v7  ;;  %v254_v17 = vpack.c.bf16 %v102_v16, %v101_v15  ;;  %v257_v21 = vpack.c.bf16 %v104_v19, %v103_v18  ;;  %244 = vmatprep.mubr.msk.f32.mxu0 %vm345_vm0, %v346_v22  ;;  %v184_v23 = vld [vmem:[%s399_s1] sm:$0xff]  ;;  %s347_s1 = smov [#allocation6]  }
  0x18   :  { %250 = vmatprep.subr.bf16.mxu0 %v340_v8  ;;  %283 = vrcp.f32 %v184_v23  ;;  %s201_s28 = sshll.u32 %s347_s1, 4  ;;  %s202_s28 = int_to_ptr.vmem [resolvable:$true] %s201_s28 }
  0x19   :  { %277 = vset.pattern.permute.xlu1 %v338_v3  ;;  %275 = vset.pattern.permute.xlu0 %v339_v4  ;;  %s307_s29 = scalar_lea.vmem %s202_s28, 128  ;;  %p312_p9 = scmp.lt.s32.totalorder %s202_s28, %s202_s28 }
  0x1a   :  { %62 = vperm.xlu1 %277, %v34_v2   ;;  %48 = vperm.xlu0 %275, %v34_v2   ;;  %p308_p8 = scmp.ne.s32.totalorder %s202_s28, %s307_s29  ;;  %p313_p10 = scmp.lt.s32.totalorder %s307_s29, %s307_s29 }
  0x1b   :  { %252 = vmatpush3.bf16.msra.mxu0 %v251_v13 }
  0x1c   :  { %253 = vmatprep.subr.bf16.mxu0 %v340_v8  ;;  %p314_p11 = por %p313_p10, %p312_p9 }
  0x1e   :  { %278 = vset.pattern.permute.xlu1 %v341_v9  ;;  %279 = vset.pattern.permute.xlu0 %v342_v10  ;;  %p315_p12 = pnand %p314_p11, %p308_p8 }
  0x1f   :  { %69 = vperm.xlu1 %278, %v34_v2   ;;  %76 = vperm.xlu0 %279, %v34_v2  }
  0x20   :  { %255 = vmatpush3.bf16.msra.mxu0 %v254_v17 }
  0x21   :  { %256 = vmatprep.subr.bf16.mxu0 %v340_v8 }
  0x22   :  { %v284_v24 = vpop.eup %283 }
  0x23   :  { %280 = vset.pattern.permute.xlu1 %v343_v14  ;;  %282 = vset.pattern.permute.xlu0 %v337_v1 }
  0x24   :  { %83 = vperm.xlu1 %280, %v34_v2   ;;  %258 = vmatpush3.bf16.msra.mxu0 %v257_v21 }
  0x25   :  { %190 = vperm.xlu0 %282, %v284_v24  }
  0x28   :  { %281 = vset.pattern.permute.xlu1 %v344_v20 }
  0x29   :  { %90 = vperm.xlu1 %281, %v34_v2  }
  0x94   :  { %v56_v26 = vpop.permute.xlu1 %55  ;;  %v42_v27 = vpop.permute.xlu0 %41 }
  0x95   :  { %vm43_vm1 = vcmp.eq.s32.totalorder %v42_v27, %v36_v28  ;;  %vm57_vm2 = vcmp.eq.s32.totalorder %v56_v26, %v36_v28 }
  0x96   :  { %v210_v31 = vsel %vm43_vm1, 1.0, %v346_v22  ;;  %v212_v34 = vsel %vm57_vm2, 1.0, %v346_v22 }
  0x99   :  { %v63_v29 = vpop.permute.xlu1 %62  ;;  %v49_v30 = vpop.permute.xlu0 %48 }
  0x9a   :  { %vm50_vm3 = vcmp.eq.s32.totalorder %v49_v30, %v36_v28  ;;  %vm64_vm4 = vcmp.eq.s32.totalorder %v63_v29, %v36_v28 }
  0x9b   :  { %v211_v32 = vsel %vm50_vm3, 1.0, %v346_v22  ;;  %v213_v38 = vsel %vm64_vm4, 1.0, %v346_v22 }
  0x9c   :  { %v53_v33 = vadd.f32 %v211_v32, %v210_v31 }
  0x9e   :  { %v60_v35 = vadd.f32 %v212_v34, %v53_v33  ;;  %v70_v36 = vpop.permute.xlu1 %69  ;;  %v77_v37 = vpop.permute.xlu0 %76 }
  0x9f   :  { %vm71_vm5 = vcmp.eq.s32.totalorder %v70_v36, %v36_v28  ;;  %vm78_vm6 = vcmp.eq.s32.totalorder %v77_v37, %v36_v28 }
  0xa0   :  { %v67_v39 = vadd.f32 %v213_v38, %v60_v35  ;;  %v214_v40 = vsel %vm71_vm5, 1.0, %v346_v22  ;;  %v215_v42 = vsel %vm78_vm6, 1.0, %v346_v22 }
  0xa2   :  { %v74_v41 = vadd.f32 %v214_v40, %v67_v39 }
  0xa3   :  { %v84_v43 = vpop.permute.xlu1 %83 }
  0xa4   :  { %vm85_vm7 = vcmp.eq.s32.totalorder %v84_v43, %v36_v28  ;;  %v81_v44 = vadd.f32 %v215_v42, %v74_v41  ;;  %v191_v50 = vpop.permute.xlu0 %190 }
  0xa5   :  { %v216_v45 = vsel %vm85_vm7, 1.0, %v346_v22 }
  0xa6   :  { %v88_v47 = vadd.f32 %v216_v45, %v81_v44 }
  0xa8   :  { %v91_v46 = vpop.permute.xlu1 %90 }
  0xa9   :  { %vm92_vm8 = vcmp.eq.s32.totalorder %v91_v46, %v36_v28 }
  0xaa   :  { %v217_v48 = vsel %vm92_vm8, 1.0, %v346_v22 }
  0xab   :  { %v95_v49 = vadd.f32 %v217_v48, %v88_v47 }
  0xad   :  { %245 = vmatmul.mubr.msk.f32.vlgmr.msra.gmra.mrb[0].mxu0 %vm105_vm9, %v95_v49 }
 0x180   :  { %v175_v51 = vpop.f32.mrb[0].mxu0 }
 0x181   :  { %v193_v52 = vmul.f32 %v191_v50, %v175_v51  ;;  %v246_v53 = vpop.f32.mrb[1].mxu0 }
 0x183   :  { %194 = vst [vmem:[#allocation6] sm:$0xff] %v193_v52 }
 0x184   :  { %318 = shalt.err (!%p315_p12)
}
 0x185   :  { %s319_s5 = scalar_lea.hbm %s401_s3, 128 }
 0x186   :  { %p320_p13 = scmp.ne.s32.totalorder %s401_s3, %s319_s5  ;;  %p323_p0 = scmp.lt.u32.totalorder %s319_s5, %s401_s3 }
 0x188   :  { %p325_p1 = pnand %p323_p0, %p320_p13 }
 0x18a   :  { %328 = shalt.err (!%p325_p1)
}
 0x18b   :  { %204 = dma.vmem_to_hbm [thread:$0]  %s202_s28, 128, %s401_s3, [#allocation5]  }
 0x18c   :  { %331 = dma.done.wait [#allocation5], 128  }
 0x18d   :  { %332 = vsyncadd [#allocation5], 4294967168 }
 0x18e   :  { %208 = vsyncpa [#allocation4], 1 }
 0x18f   :  { %209 = vsyncpa [#allocation5], 1 }

</bundles_post_ra>
